<compile_context>
chip_gen: v5e
topology: v5e:2x2
jax: 0.10.0
libtpu: 0.0.40
codegen_flags: <defaults>
</compile_context>

<pallas_src>
import jax
import jax.numpy as jnp
import numpy as np
from jax.experimental import pallas as pl
from jax.experimental.pallas import tpu as pltpu


# ----------------------------------------------------------------------------
# Fused kernel: surrogate SU2 solve + feature-major coarse_y assembly, one N-tile.
#   aoa_ref, mach_ref : (B,)      f32, SMEM  (scalar reads)
#   nodes_t_ref       : (2, TN)   f32, VMEM  (row 0 = x, row 1 = y; lane-dense over N)
#   cy_ref            : (C, B, TN) f32, VMEM (feature-major coarse_y tile)
# ----------------------------------------------------------------------------
def _cfd_kernel(aoa_ref, mach_ref, nodes_t_ref, cy_ref):
    x = nodes_t_ref[0:1, :]            # (1, TN) -- batch_x[..., 0] is identical for every b
    y = nodes_t_ref[1:2, :]            # (1, TN) -- batch_x[..., 1] is identical for every b

    # TODO(synk): the real SU2Module is an external CFD solver (subprocess + .su2 mesh files);
    #             a deterministic surrogate with identical shapes/dtypes stands in here.
    # B-invariant transcendental basis, computed ONCE per N-tile (EUP slot, effectively free
    # in this store-bound regime).
    basis_p = jnp.sin(3.0 * x) * jnp.cos(2.0 * y)      # (1, TN)
    basis_vx = jnp.exp(-x * x)                         # (1, TN)
    lin_vx = 0.1 * y                                   # (1, TN)
    basis_vy = jnp.tanh(x + y)                         # (1, TN)

    B = cy_ref.shape[1]
    for b in range(B):                 # small static batch -> unrolled; per-b work is a scalar FMA
        aoa = aoa_ref[b]               # scalar from SMEM (no lane-0 broadcast)
        mach = mach_ref[b]
        cy_ref[0, b:b + 1, :] = basis_p + 0.01 * aoa            # pressure
        cy_ref[1, b:b + 1, :] = mach * basis_vx + lin_vx        # vel_x
        cy_ref[2, b:b + 1, :] = mach * basis_vy - 0.01 * aoa    # vel_y


def cfd_fused(nodes_t, aoa, mach, *, tn, n_fields=3):
    _, n_pad = nodes_t.shape
    B = aoa.shape[0]
    C = n_fields
    assert n_pad % tn == 0 and tn % 128 == 0

    # Advisory cost hint so XLA can overlap this memory-bound kernel with neighbouring ops.
    cost = pl.CostEstimate(
        flops=int(6 * B * n_pad + 6 * n_pad),
        transcendentals=int(4 * n_pad),
        bytes_accessed=int(4 * (2 * n_pad + 2 * B + C * B * n_pad)),
    )

    return pl.pallas_call(
        _cfd_kernel,
        out_shape=jax.ShapeDtypeStruct((C, B, n_pad), nodes_t.dtype),
        grid=(n_pad // tn,),
        in_specs=[
            pl.BlockSpec(memory_space=pltpu.MemorySpace.SMEM),   # aoa  (B,) -> SMEM scalars
            pl.BlockSpec(memory_space=pltpu.MemorySpace.SMEM),   # mach (B,) -> SMEM scalars
            pl.BlockSpec((2, tn), lambda i: (0, i)),             # lane-dense node tile
        ],
        out_specs=pl.BlockSpec((C, B, tn), lambda i: (0, 0, i)),
        compiler_params=pltpu.CompilerParams(
            # N-tiles are independent -> shards across v7x's two TensorCores; harmless on v5e/v6e.
            dimension_semantics=("parallel",),
            # Per-step double-buffered VMEM is ~2 * (2 + C*B) * tn * 4 B  (tiny here); for huge
            # meshes / large B re-derive tn against v7x's 32 MiB scoped / 64 MiB physical VMEM.
        ),
        cost_estimate=cost,
    )(aoa, mach, nodes_t)


# ----------------------------------------------------------------------------
# CFD.forward
# ----------------------------------------------------------------------------
def cfd_forward(nodes, aoa, mach, sim_info=None, tn=512):
    """Pallas implementation of CFD.forward (batch.aoa -> aoa, batch.mach_or_reynolds -> mach)."""
    if sim_info is None:
        sim_info = {}

    N = nodes.shape[0]
    B = aoa.shape[0]
    C = 3

    # TODO(synk): self.write_mesh_file(...) writes a .su2 mesh file to disk — pure host file I/O,
    #             no Pallas equivalent; skipped.

    # Lane-dense node slab; pad N up to a multiple of the tile so the grid divides evenly
    # (ragged-tail handling — padded lanes are computed on dummy zeros and sliced off below).
    n128 = pl.cdiv(N, 128) * 128
    tn = max(128, min((tn // 128) * 128, n128))
    n_pad = pl.cdiv(N, tn) * tn
    nodes_t = nodes[:, :2].T                                     # (2, N)
    if n_pad != N:
        nodes_t = jnp.pad(nodes_t, ((0, 0), (0, n_pad - N)))     # (2, n_pad)

    # batch_x = nodes.expand(B, -1, -1) is never materialized: the kernel broadcasts lazily.
    cy_slab = cfd_fused(nodes_t, aoa, mach, tn=tn, n_fields=C)   # (C, B, n_pad) feature-major
    cy_slab = cy_slab[:, :, :N]                                  # drop ragged-tail padding

    # Layout plumbing back to the module's row-major (B*N, C) contract.  In a real pipeline the
    # feature-major slab (exposed below) should be consumed directly to avoid this transpose.
    coarse_y = cy_slab.reshape(C, B * N).T                       # (B*N, C)
    # coarse_x is a pure replication of nodes -> built wrapper-side (no kernel write traffic).
    coarse_x = jnp.tile(nodes[:, :2], (B, 1))                    # (B*N, 2)
    # coarse_batch is a compile-time pattern.
    coarse_batch = jnp.repeat(jnp.arange(B, dtype=jnp.int32), N)

    # self.process_sim defaults to identity and CFD has num_convs = num_end_convs = 0.
    fine_y = coarse_y
    sim_info["nodes"] = coarse_x
    sim_info["batch"] = coarse_batch
    sim_info["output"] = coarse_y
    sim_info["output_feature_major"] = cy_slab                   # (C, B, N): preferred downstream layout
    # TODO(synk): sim_info['elems'] is host-side mesh connectivity (list of numpy index arrays) —
    #             no device-tensor equivalent; skipped.
    return fine_y, sim_info


# ----------------------------------------------------------------------------
# Pure-JAX reference for verification (same deterministic SU2 surrogate).
# ----------------------------------------------------------------------------
def surrogate_su2_ref(x, y, aoa, mach):
    pressure = jnp.sin(3.0 * x) * jnp.cos(2.0 * y) + 0.01 * aoa
    vel_x = mach * jnp.exp(-x * x) + 0.1 * y
    vel_y = mach * jnp.tanh(x + y) - 0.01 * aoa
    return (pressure, vel_x, vel_y)


def cfd_forward_ref(nodes, aoa, mach):
    B = aoa.shape[0]
    N = nodes.shape[0]
    batch_x = jnp.broadcast_to(nodes[None], (B, N, nodes.shape[1]))
    batch_y = surrogate_su2_ref(batch_x[..., 0], batch_x[..., 1], aoa[:, None], mach[:, None])
    coarse_y = jnp.stack([y.reshape(-1) for y in batch_y], axis=1)
    coarse_x = jnp.tile(nodes[:, :2], (B, 1))
    coarse_batch = jnp.repeat(jnp.arange(B, dtype=jnp.int32), N)
    return coarse_y, coarse_x, coarse_batch


if __name__ == "__main__":
    B = 4          # batch size (batch.aoa.shape[0])
    N = 300        # number of coarse-mesh nodes (NOT a multiple of 128 -> exercises padding path)
    D = 2          # node coordinate dim
    TN = 128       # N-tile -> grid of 3 steps at this size

    key = jax.random.PRNGKey(0)
    k1, k2, k3 = jax.random.split(key, 3)
    # self.nodes is the module's only parameter (nn.Parameter) — deterministic init.
    nodes = jax.random.uniform(k1, (N, D), dtype=jnp.float32)
    aoa = jax.random.uniform(k2, (B,), dtype=jnp.float32) * 10.0
    mach = jax.random.uniform(k3, (B,), dtype=jnp.float32)

    fine_y, sim_info = cfd_forward(nodes, aoa, mach, tn=TN)
    jax.block_until_ready(fine_y)

    ref_y, ref_x, ref_b = cfd_forward_ref(nodes, aoa, mach)
    assert fine_y.shape == (B * N, 3) and fine_y.dtype == jnp.float32
    np.testing.assert_allclose(np.asarray(fine_y), np.asarray(ref_y), rtol=1e-5, atol=1e-5)
    np.testing.assert_allclose(np.asarray(sim_info["nodes"]), np.asarray(ref_x), rtol=1e-6, atol=1e-6)
    np.testing.assert_array_equal(np.asarray(sim_info["batch"]), np.asarray(ref_b))
    # feature-major slab must be the transpose of coarse_y
    np.testing.assert_allclose(
        np.asarray(sim_info["output_feature_major"].reshape(3, B * N).T),
        np.asarray(ref_y), rtol=1e-5, atol=1e-5)

    print("KERNEL_OK")
</pallas_src>

<mosaic_0001>
module attributes {stable_mosaic.version = 11 : i64} {
  func.func @_cfd_kernel(%arg0: i32, %arg1: memref<4xf32, #tpu.memory_space<smem>>, %arg2: memref<4xf32, #tpu.memory_space<smem>>, %arg3: memref<2x128xf32, #tpu.memory_space<vmem>>, %arg4: memref<3x4x128xf32, #tpu.memory_space<vmem>>) attributes {dimension_semantics = [#tpu.dimension_semantics<parallel>], iteration_bounds = array<i64: 3>, scalar_prefetch = 0 : i64, scratch_operands = 0 : i64, tpu.core_type = #tpu.core_type<tc>, window_params = [{transform_indices = @transform_0, window_bounds = array<i64: 4>}, {transform_indices = @transform_1, window_bounds = array<i64: 4>}, {transform_indices = @transform_2, window_bounds = array<i64: 2, 128>}, {transform_indices = @transform_3, window_bounds = array<i64: 3, 4, 128>}]} {
    %c0 = arith.constant 0 : index
    %c0_0 = arith.constant 0 : index
    %0 = vector.load %arg3[%c0, %c0_0] : memref<2x128xf32, #tpu.memory_space<vmem>>, vector<1x128xf32>
    %c1 = arith.constant 1 : index
    %c0_1 = arith.constant 0 : index
    %1 = vector.load %arg3[%c1, %c0_1] : memref<2x128xf32, #tpu.memory_space<vmem>>, vector<1x128xf32>
    %cst = arith.constant 3.000000e+00 : f32
    %2 = vector.broadcast %cst : f32 to vector<1x128xf32>
    %3 = arith.mulf %2, %0 : vector<1x128xf32>
    %4 = math.sin %3 : vector<1x128xf32>
    %cst_2 = arith.constant 2.000000e+00 : f32
    %5 = vector.broadcast %cst_2 : f32 to vector<1x128xf32>
    %6 = arith.mulf %5, %1 : vector<1x128xf32>
    %7 = math.cos %6 : vector<1x128xf32>
    %8 = arith.mulf %4, %7 : vector<1x128xf32>
    %cst_3 = arith.constant 0.000000e+00 : f32
    %9 = vector.broadcast %cst_3 : f32 to vector<1x128xf32>
    %10 = arith.subf %9, %0 : vector<1x128xf32>
    %11 = arith.mulf %10, %0 : vector<1x128xf32>
    %12 = math.exp %11 : vector<1x128xf32>
    %cst_4 = arith.constant 1.000000e-01 : f32
    %13 = vector.broadcast %cst_4 : f32 to vector<1x128xf32>
    %14 = arith.mulf %13, %1 : vector<1x128xf32>
    %15 = arith.addf %0, %1 : vector<1x128xf32>
    %16 = math.tanh %15 : vector<1x128xf32>
    %c0_5 = arith.constant 0 : index
    %17 = memref.load %arg1[%c0_5] : memref<4xf32, #tpu.memory_space<smem>>
    %c0_6 = arith.constant 0 : index
    %18 = memref.load %arg2[%c0_6] : memref<4xf32, #tpu.memory_space<smem>>
    %cst_7 = arith.constant 0.00999999977 : f32
    %19 = arith.mulf %cst_7, %17 : f32
    %20 = vector.broadcast %19 : f32 to vector<1x128xf32>
    %21 = arith.addf %8, %20 : vector<1x128xf32>
    %c0_8 = arith.constant 0 : index
    %c0_9 = arith.constant 0 : index
    %c0_10 = arith.constant 0 : index
    %22 = vector.load %arg4[%c0_8, %c0_9, %c0_10] : memref<3x4x128xf32, #tpu.memory_space<vmem>>, vector<1x1x128xf32>
    %23 = vector.shape_cast %22 : vector<1x1x128xf32> to vector<1x128xf32>
    %24 = vector.shape_cast %21 : vector<1x128xf32> to vector<1x1x128xf32>
    tpu.vector_store %arg4[%c0_8, %c0_9, %c0_10], %24 {strides = array<i32>} : memref<3x4x128xf32, #tpu.memory_space<vmem>>, vector<1x1x128xf32>,
    %25 = vector.broadcast %18 : f32 to vector<1x128xf32>
    %26 = arith.mulf %25, %12 : vector<1x128xf32>
    %27 = arith.addf %26, %14 : vector<1x128xf32>
    %c1_11 = arith.constant 1 : index
    %c0_12 = arith.constant 0 : index
    %c0_13 = arith.constant 0 : index
    %28 = vector.load %arg4[%c1_11, %c0_12, %c0_13] : memref<3x4x128xf32, #tpu.memory_space<vmem>>, vector<1x1x128xf32>
    %29 = vector.shape_cast %28 : vector<1x1x128xf32> to vector<1x128xf32>
    %30 = vector.shape_cast %27 : vector<1x128xf32> to vector<1x1x128xf32>
    tpu.vector_store %arg4[%c1_11, %c0_12, %c0_13], %30 {strides = array<i32>} : memref<3x4x128xf32, #tpu.memory_space<vmem>>, vector<1x1x128xf32>,
    %31 = vector.broadcast %18 : f32 to vector<1x128xf32>
    %32 = arith.mulf %31, %16 : vector<1x128xf32>
    %cst_14 = arith.constant 0.00999999977 : f32
    %33 = arith.mulf %cst_14, %17 : f32
    %34 = vector.broadcast %33 : f32 to vector<1x128xf32>
    %35 = arith.subf %32, %34 : vector<1x128xf32>
    %c2 = arith.constant 2 : index
    %c0_15 = arith.constant 0 : index
    %c0_16 = arith.constant 0 : index
    %36 = vector.load %arg4[%c2, %c0_15, %c0_16] : memref<3x4x128xf32, #tpu.memory_space<vmem>>, vector<1x1x128xf32>
    %37 = vector.shape_cast %36 : vector<1x1x128xf32> to vector<1x128xf32>
    %38 = vector.shape_cast %35 : vector<1x128xf32> to vector<1x1x128xf32>
    tpu.vector_store %arg4[%c2, %c0_15, %c0_16], %38 {strides = array<i32>} : memref<3x4x128xf32, #tpu.memory_space<vmem>>, vector<1x1x128xf32>,
    %c1_17 = arith.constant 1 : index
    %39 = memref.load %arg1[%c1_17] : memref<4xf32, #tpu.memory_space<smem>>
    %c1_18 = arith.constant 1 : index
    %40 = memref.load %arg2[%c1_18] : memref<4xf32, #tpu.memory_space<smem>>
    %cst_19 = arith.constant 0.00999999977 : f32
    %41 = arith.mulf %cst_19, %39 : f32
    %42 = vector.broadcast %41 : f32 to vector<1x128xf32>
    %43 = arith.addf %8, %42 : vector<1x128xf32>
    %c0_20 = arith.constant 0 : index
    %c1_21 = arith.constant 1 : index
    %c0_22 = arith.constant 0 : index
    %44 = vector.load %arg4[%c0_20, %c1_21, %c0_22] : memref<3x4x128xf32, #tpu.memory_space<vmem>>, vector<1x1x128xf32>
    %45 = vector.shape_cast %44 : vector<1x1x128xf32> to vector<1x128xf32>
    %46 = vector.shape_cast %43 : vector<1x128xf32> to vector<1x1x128xf32>
    tpu.vector_store %arg4[%c0_20, %c1_21, %c0_22], %46 {strides = array<i32>} : memref<3x4x128xf32, #tpu.memory_space<vmem>>, vector<1x1x128xf32>,
    %47 = vector.broadcast %40 : f32 to vector<1x128xf32>
    %48 = arith.mulf %47, %12 : vector<1x128xf32>
    %49 = arith.addf %48, %14 : vector<1x128xf32>
    %c1_23 = arith.constant 1 : index
    %c1_24 = arith.constant 1 : index
    %c0_25 = arith.constant 0 : index
    %50 = vector.load %arg4[%c1_23, %c1_24, %c0_25] : memref<3x4x128xf32, #tpu.memory_space<vmem>>, vector<1x1x128xf32>
    %51 = vector.shape_cast %50 : vector<1x1x128xf32> to vector<1x128xf32>
    %52 = vector.shape_cast %49 : vector<1x128xf32> to vector<1x1x128xf32>
    tpu.vector_store %arg4[%c1_23, %c1_24, %c0_25], %52 {strides = array<i32>} : memref<3x4x128xf32, #tpu.memory_space<vmem>>, vector<1x1x128xf32>,
    %53 = vector.broadcast %40 : f32 to vector<1x128xf32>
    %54 = arith.mulf %53, %16 : vector<1x128xf32>
    %cst_26 = arith.constant 0.00999999977 : f32
    %55 = arith.mulf %cst_26, %39 : f32
    %56 = vector.broadcast %55 : f32 to vector<1x128xf32>
    %57 = arith.subf %54, %56 : vector<1x128xf32>
    %c2_27 = arith.constant 2 : index
    %c1_28 = arith.constant 1 : index
    %c0_29 = arith.constant 0 : index
    %58 = vector.load %arg4[%c2_27, %c1_28, %c0_29] : memref<3x4x128xf32, #tpu.memory_space<vmem>>, vector<1x1x128xf32>
    %59 = vector.shape_cast %58 : vector<1x1x128xf32> to vector<1x128xf32>
    %60 = vector.shape_cast %57 : vector<1x128xf32> to vector<1x1x128xf32>
    tpu.vector_store %arg4[%c2_27, %c1_28, %c0_29], %60 {strides = array<i32>} : memref<3x4x128xf32, #tpu.memory_space<vmem>>, vector<1x1x128xf32>,
    %c2_30 = arith.constant 2 : index
    %61 = memref.load %arg1[%c2_30] : memref<4xf32, #tpu.memory_space<smem>>
    %c2_31 = arith.constant 2 : index
    %62 = memref.load %arg2[%c2_31] : memref<4xf32, #tpu.memory_space<smem>>
    %cst_32 = arith.constant 0.00999999977 : f32
    %63 = arith.mulf %cst_32, %61 : f32
    %64 = vector.broadcast %63 : f32 to vector<1x128xf32>
    %65 = arith.addf %8, %64 : vector<1x128xf32>
    %c0_33 = arith.constant 0 : index
    %c2_34 = arith.constant 2 : index
    %c0_35 = arith.constant 0 : index
    %66 = vector.load %arg4[%c0_33, %c2_34, %c0_35] : memref<3x4x128xf32, #tpu.memory_space<vmem>>, vector<1x1x128xf32>
    %67 = vector.shape_cast %66 : vector<1x1x128xf32> to vector<1x128xf32>
    %68 = vector.shape_cast %65 : vector<1x128xf32> to vector<1x1x128xf32>
    tpu.vector_store %arg4[%c0_33, %c2_34, %c0_35], %68 {strides = array<i32>} : memref<3x4x128xf32, #tpu.memory_space<vmem>>, vector<1x1x128xf32>,
    %69 = vector.broadcast %62 : f32 to vector<1x128xf32>
    %70 = arith.mulf %69, %12 : vector<1x128xf32>
    %71 = arith.addf %70, %14 : vector<1x128xf32>
    %c1_36 = arith.constant 1 : index
    %c2_37 = arith.constant 2 : index
    %c0_38 = arith.constant 0 : index
    %72 = vector.load %arg4[%c1_36, %c2_37, %c0_38] : memref<3x4x128xf32, #tpu.memory_space<vmem>>, vector<1x1x128xf32>
    %73 = vector.shape_cast %72 : vector<1x1x128xf32> to vector<1x128xf32>
    %74 = vector.shape_cast %71 : vector<1x128xf32> to vector<1x1x128xf32>
    tpu.vector_store %arg4[%c1_36, %c2_37, %c0_38], %74 {strides = array<i32>} : memref<3x4x128xf32, #tpu.memory_space<vmem>>, vector<1x1x128xf32>,
    %75 = vector.broadcast %62 : f32 to vector<1x128xf32>
    %76 = arith.mulf %75, %16 : vector<1x128xf32>
    %cst_39 = arith.constant 0.00999999977 : f32
    %77 = arith.mulf %cst_39, %61 : f32
    %78 = vector.broadcast %77 : f32 to vector<1x128xf32>
    %79 = arith.subf %76, %78 : vector<1x128xf32>
    %c2_40 = arith.constant 2 : index
    %c2_41 = arith.constant 2 : index
    %c0_42 = arith.constant 0 : index
    %80 = vector.load %arg4[%c2_40, %c2_41, %c0_42] : memref<3x4x128xf32, #tpu.memory_space<vmem>>, vector<1x1x128xf32>
    %81 = vector.shape_cast %80 : vector<1x1x128xf32> to vector<1x128xf32>
    %82 = vector.shape_cast %79 : vector<1x128xf32> to vector<1x1x128xf32>
    tpu.vector_store %arg4[%c2_40, %c2_41, %c0_42], %82 {strides = array<i32>} : memref<3x4x128xf32, #tpu.memory_space<vmem>>, vector<1x1x128xf32>,
    %c3 = arith.constant 3 : index
    %83 = memref.load %arg1[%c3] : memref<4xf32, #tpu.memory_space<smem>>
    %c3_43 = arith.constant 3 : index
    %84 = memref.load %arg2[%c3_43] : memref<4xf32, #tpu.memory_space<smem>>
    %cst_44 = arith.constant 0.00999999977 : f32
    %85 = arith.mulf %cst_44, %83 : f32
    %86 = vector.broadcast %85 : f32 to vector<1x128xf32>
    %87 = arith.addf %8, %86 : vector<1x128xf32>
    %c0_45 = arith.constant 0 : index
    %c3_46 = arith.constant 3 : index
    %c0_47 = arith.constant 0 : index
    %88 = vector.load %arg4[%c0_45, %c3_46, %c0_47] : memref<3x4x128xf32, #tpu.memory_space<vmem>>, vector<1x1x128xf32>
    %89 = vector.shape_cast %88 : vector<1x1x128xf32> to vector<1x128xf32>
    %90 = vector.shape_cast %87 : vector<1x128xf32> to vector<1x1x128xf32>
    tpu.vector_store %arg4[%c0_45, %c3_46, %c0_47], %90 {strides = array<i32>} : memref<3x4x128xf32, #tpu.memory_space<vmem>>, vector<1x1x128xf32>,
    %91 = vector.broadcast %84 : f32 to vector<1x128xf32>
    %92 = arith.mulf %91, %12 : vector<1x128xf32>
    %93 = arith.addf %92, %14 : vector<1x128xf32>
    %c1_48 = arith.constant 1 : index
    %c3_49 = arith.constant 3 : index
    %c0_50 = arith.constant 0 : index
    %94 = vector.load %arg4[%c1_48, %c3_49, %c0_50] : memref<3x4x128xf32, #tpu.memory_space<vmem>>, vector<1x1x128xf32>
    %95 = vector.shape_cast %94 : vector<1x1x128xf32> to vector<1x128xf32>
    %96 = vector.shape_cast %93 : vector<1x128xf32> to vector<1x1x128xf32>
    tpu.vector_store %arg4[%c1_48, %c3_49, %c0_50], %96 {strides = array<i32>} : memref<3x4x128xf32, #tpu.memory_space<vmem>>, vector<1x1x128xf32>,
    %97 = vector.broadcast %84 : f32 to vector<1x128xf32>
    %98 = arith.mulf %97, %16 : vector<1x128xf32>
    %cst_51 = arith.constant 0.00999999977 : f32
    %99 = arith.mulf %cst_51, %83 : f32
    %100 = vector.broadcast %99 : f32 to vector<1x128xf32>
    %101 = arith.subf %98, %100 : vector<1x128xf32>
    %c2_52 = arith.constant 2 : index
    %c3_53 = arith.constant 3 : index
    %c0_54 = arith.constant 0 : index
    %102 = vector.load %arg4[%c2_52, %c3_53, %c0_54] : memref<3x4x128xf32, #tpu.memory_space<vmem>>, vector<1x1x128xf32>
    %103 = vector.shape_cast %102 : vector<1x1x128xf32> to vector<1x128xf32>
    %104 = vector.shape_cast %101 : vector<1x128xf32> to vector<1x1x128xf32>
    tpu.vector_store %arg4[%c2_52, %c3_53, %c0_54], %104 {strides = array<i32>} : memref<3x4x128xf32, #tpu.memory_space<vmem>>, vector<1x1x128xf32>,
    return
  }
  func.func @transform_0(%arg0: i32) -> i32 {
    %c0_i32 = arith.constant 0 : i32
    %c0_i32_0 = arith.constant 0 : i32
    return %c0_i32 : i32
  }
  func.func @transform_1(%arg0: i32) -> i32 {
    %c0_i32 = arith.constant 0 : i32
    %c0_i32_0 = arith.constant 0 : i32
    return %c0_i32 : i32
  }
  func.func @transform_2(%arg0: i32) -> (i32, i32) {
    %c0_i32 = arith.constant 0 : i32
    %c0_i32_0 = arith.constant 0 : i32
    return %c0_i32, %arg0 : i32, i32
  }
  func.func @transform_3(%arg0: i32) -> (i32, i32, i32) {
    %c0_i32 = arith.constant 0 : i32
    %c0_i32_0 = arith.constant 0 : i32
    %c0_i32_1 = arith.constant 0 : i32
    return %c0_i32, %c0_i32_0, %arg0 : i32, i32, i32
  }
}

</mosaic_0001>

<bundles_post_ra>
// kernel: tpu_custom_call.1
= control target key start
LH: loop header
LB: loop body
LE: loop exit
PB: predicated region body
PF: predicated region fallthrough
CT: control target
= control target key end

     0   :  { %8 = vsyncpa [#allocation5], 0  ;;  %s1390_s0 = inlined_call_operand.hbm [shape: f32[4], index: 0, kind: input, shape index: {}]   ;;  %s1391_s1 = inlined_call_operand.hbm [shape: f32[4], index: 1, kind: input, shape index: {}]   ;;  %s1392_s2 = inlined_call_operand.hbm [shape: f32[2,384], index: 2, kind: input, shape index: {}]   ;;  %s1393_s3 = inlined_call_operand.hbm [shape: f32[3,4,384], index: 3, kind: output, shape index: {}]  }
   0x1   :  { %9 = vsyncpa [#allocation7], 0 }
   0x2   :  { %10 = vsyncpa [#allocation3], 0 }
   0x3   :  { %12 = vsyncpa [#allocation3 + $0x1], 0 }
   0x4   :  { %13 = vsyncpa [#allocation4], 0 }
   0x5   :  { %15 = vsyncpa [#allocation4 + $0x1], 0  ;;  %s984_s12 = smov 0   ;;  %s986_s13 = smov 0  }
   0x6   :  { %s988_s14 = smov 0   ;;  %s990_s15 = smov 0  }
   0x7 LB: > { %s1005_s16 = sadd.s32 4294967295, %s950_s15   ;;  %s700_s17 = sadd.s32 4294967294, %s950_s15   ;;  %s950_s15 = sphi %s990_s15, %s1406_s15   ;;  %s946_s14 = sphi %s988_s14, %s1405_s14   ;;  %s942_s13 = sphi %s986_s13, %s1404_s13   ;;  %s938_s12 = sphi %s984_s12, %s1403_s12  }
   0x8   : > { %p83_p0 = scmp.ne.s32.totalorder %s942_s13, %s938_s12  ;;  %p84_p1 = scmp.eq.s32.totalorder %s1005_s16, 0 }
   0x9   : > { %p107_p2 = scmp.eq.s32.totalorder %s1005_s16, 2  ;;  %p113_p3 = scmp.eq.s32.totalorder %s700_s17, 2 }
   0xa   : > { %p1014_p4 = por %p84_p1, %p83_p0  ;;  %p701_p5 = scmp.ge.s32.totalorder %s950_s15, 1 }
   0xb   : > { %p1019_p6 = por %p113_p3, %p83_p0  ;;  %p120_p7 = scmp.lt.s32.totalorder %s950_s15, 4 }
   0xc   : > { %s132_s22 = sshll.u32 %s1390_s0, 4  ;;  %s142_s26 = sshll.u32 %s1391_s1, 4  ;;  %s133_s22 = int_to_ptr.hbm [resolvable:$true] %s132_s22  ;;  %s143_s26 = int_to_ptr.hbm [resolvable:$true] %s142_s26 }
   0xd   : > { %p1027_p8 = pnand %p701_p5, %p120_p7  ;;  %s1039_s27 = sadd.s32 1, %s950_s15  }
   0xe   : > { %s67_s28 = ssub.s32 %s950_s15, %s1039_s27  ;;  %s952_s29 = smov [#allocation2]  }
   0xf   : > { %p747_p9 = pneg %p1027_p8  ;;  %s953_s30 = smov [#allocation6]  }
  0x10   : > { %p68_p11 = scmp.eq.s32.totalorder %s67_s28, 0  ;;  %s70_s4 = sadd.s32 1, %s946_s14 }
  0x11   : > { %p748_p10 = pnand %p747_p9, %p84_p1  ;;  %p77_p12 = scmp.ne.s32.totalorder %s946_s14, %s942_s13 }
  0x12   : > { %p78_p13 = scmp.eq.s32.totalorder %s950_s15, 0  ;;  %p764_p5 = scmp.lt.s32.totalorder %s950_s15, 3 }
  0x13   : > { %750 = dma.hbm_to_smem (!%p748_p10), %s133_s22, 16, %s952_s29, [#allocation5]  }
  0x14   : > { %753 = dma.hbm_to_smem (!%p748_p10), %s143_s26, 16, %s953_s30, [#allocation7]  }
  0x15   : > { %s1048_s5 = scalar_select %p68_p11, %s946_s14, %s70_s4  }
  0x16   : > { %p79_p0 = por %p78_p13, %p77_p12  ;;  %p1052_p3 = por %p107_p2, %p77_p12 }
  0x17   : > { %s153_s7 = sand.u32 1, %s946_s14   ;;  %s706_s9 = sshll.u32 %s950_s15, 1 }
  0x18   : > { %s705_s8 = sshll.u32 %s153_s7, 1  ;;  %s161_s17 = scalar_lea.hbm %s1392_s2, %s706_s9 }
  0x19   : > { %s157_s20 = scalar_lea.vmem [#allocation8], %s705_s8  ;;  %s163_s22 = sshll.u32 %s161_s17, 4  ;;  %s164_s22 = int_to_ptr.hbm [resolvable:$true] %s163_s22 }
  0x1a   : > { %s165_s21 = sshll.u32 %s157_s20, 4  ;;  %p1062_p7 = pnand %p764_p5, %p79_p0  ;;  %s166_s21 = int_to_ptr.vmem [resolvable:$true] %s165_s21 }
  0x1b   : > { %s154_s25 = scalar_lea.sflag [#allocation3], %s153_s7  ;;  %s846_s26 = sshra.s32 %s164_s22, 4  ;;  %s847_s26 = int_to_ptr.hbm [resolvable:$true] %s846_s26 }
  0x1c   : > { %s848_s28 = scalar_lea.hbm %s847_s26, 2  ;;  %p850_p9 = pneg %p1062_p7 }
  0x1d   : > { %p849_p2 = scmp.ne.s32.totalorder %s847_s26, %s848_s28  ;;  %s853_s4 = scalar_lea.hbm %s1392_s2, 6 }
  0x1e   : > { %p854_p12 = scmp.lt.s32.totalorder %s847_s26, %s1392_s2  ;;  %p855_p13 = scmp.lt.s32.totalorder %s853_s4, %s848_s28 }
  0x1f   : > { %p851_p10 = pnand %p850_p9, %p849_p2 }
  0x20   : > { %p856_p0 = por %p855_p13, %p854_p12 }
  0x21   : > { %p852_p11 = pneg %p851_p10 }
  0x23   : > { %p857_p5 = pnand %p856_p0, %p852_p11 }
  0x25   : > { %860 = shalt.err (!%p857_p5)
}
  0x26   : > { %757 = dma.hbm_to_vmem [thread:$0]  (!%p1062_p7), %s164_s22, 32, %s166_s21, %s154_s25  }
  0x27   : > { %174 = sbr.rel (%p1027_p8) target bundleno = 184 (0xb8), region = 32 }
  0x2c   : > { %921 = dma.done.wait (%p84_p1), [#allocation5], 16  }
  0x2d   : > { %923 = vsyncadd (%p84_p1), [#allocation5], 4294967280 }
  0x2e   : > { %925 = dma.done.wait (%p84_p1), [#allocation7], 16  }
  0x2f   : > { %927 = vsyncadd (%p84_p1), [#allocation7], 4294967280  ;;  %s1087_s7 = sand.u32 1, %s942_s13  }
  0x30   : > { %s710_s23 = sshll.u32 %s1087_s7, 1  ;;  %s187_s10 = scalar_lea.sflag [#allocation3], %s1087_s7 }
  0x31   : > { %s190_s11 = scalar_lea.vmem [#allocation8], %s710_s23 }
  0x32   : > { %929 = dma.done.wait (%p1014_p4), %s187_s10, 32  }
  0x33   : > { %931 = vsyncadd (%p1014_p4), %s187_s10, 4294967264 }
  0x34   : > { %196 = sfence }
  0x35   : > { %v1095_v0 = vld [vmem:[%s190_s11] sm:$0x1]  ;;  %v1097_v1 = vld [vmem:[%s190_s11 + $0x1] sm:$0x1]  ;;  %v954_v25 = vmov 683565275  }
  0x36   : > { %v1100_v2 = vmul.f32 3.0, %v1095_v0  ;;  %v1103_v3 = vmul.f32 2.0, %v1097_v1  ;;  %v955_v27 = vmov 2475754826   ;;  %v956_v29 = vmov 2131351028  }
  0x37   : > { %v957_v31 = vmov 2102212464   ;;  %v958_v33 = vmov 920167782   ;;  %v959_v42 = vmov 1326507024  }
  0x38   : > { %v218_v4 = vand.u32 2147483647, %v1100_v2  ;;  %v221_v5 = vand.u32 2139095040, %v1100_v2  ;;  %v374_v6 = vand.u32 2147483647, %v1103_v3  ;;  %v377_v7 = vand.u32 2139095040, %v1103_v3 }
  0x39   : > { %s1246_s18 = sld [smem:[#allocation2]]  ;;  %s734_s26 = smul.u32 12, %s1087_s7 }
  0x3a   : > { %v222_v8 = vshrl.u32 %v221_v5, 23  ;;  %v225_v9 = vand.u32 8388607, %v218_v4  ;;  %v378_v10 = vshrl.u32 %v377_v7, 23  ;;  %v381_v14 = vand.u32 8388607, %v374_v6 }
  0x3b   : > { %s1257_s17 = sld [smem:[#allocation2 + $0x1]]  ;;  %s1305_s9 = scalar_lea.vmem [#allocation9], %s734_s26 }
  0x3c   : > { %v711_v11 = vadd.s32 4294967169, %v222_v8  ;;  %v226_v12 = vor.u32 8388608, %v225_v9  ;;  %v714_v13 = vadd.s32 4294967169, %v378_v10  ;;  %v382_v19 = vor.u32 8388608, %v381_v14  ;;  %s1266_s20 = sld [smem:[#allocation6]]  ;;  %s731_s23 = sshll.u32 %s1005_s16, 2 }
  0x3d   : > { %s1272_s21 = sld [smem:[#allocation2 + $0x2]]  ;;  %s591_s16 = scalar_lea.sflag [#allocation4], %s1087_s7 }
  0x3e   : > { %v228_v15 = vadd.s32 1, %v711_v11  ;;  %v384_v16 = vadd.s32 1, %v714_v13  ;;  %v1113_v18 = vshll.u32 %v226_v12, 8  ;;  %v1123_v36 = vshll.u32 %v382_v19, 8  ;;  %s1274_s22 = sld [smem:[#allocation6 + $0x1]]  ;;  %s896_s26 = scalar_lea.hbm %s1393_s3, 36 }
  0x3f   : > { %s538_s24 = smul.f32 0.01, %s1246_s18  ;;  %s1279_s25 = sld [smem:[#allocation2 + $0x3]] }
  0x40   : > { %vm229_vm0 = vcmp.gt.s32.totalorder %v228_v15, 0  ;;  %vm385_vm1 = vcmp.gt.s32.totalorder %v384_v16, 0  ;;  %v267_v35 = vand.u32 65535, %v1113_v18  ;;  %v268_v40 = vshrl.u32 %v1113_v18, 16  ;;  %s1282_s28 = sld [smem:[#allocation6 + $0x2]]  ;;  %s601_s18 = scalar_lea.hbm %s1393_s3, %s731_s23 }
  0x41   : > { %v230_v17 = vsel %vm229_vm0, %v228_v15, 0  ;;  %v386_v21 = vsel %vm385_vm1, %v384_v16, 0  ;;  %s553_s29 = smul.f32 0.01, %s1257_s17  ;;  %s1287_s30 = sld [smem:[#allocation6 + $0x3]] }
  0x42   : > { %v232_v20 = vand.u32 31, %v230_v17  ;;  %v1115_v22 = vshrl.u32 %v230_v17, 5  ;;  %v1117_v23 = vand.u32 31, %v386_v21  ;;  %v1141_v53 = vshrl.u32 %v386_v21, 5  ;;  %s602_s17 = sshll.u32 %s1305_s9, 4  ;;  %s603_s17 = int_to_ptr.vmem [resolvable:$true] %s602_s17 }
  0x43   : > { %s566_s4 = smul.f32 0.01, %s1272_s21 }
  0x44   : > { %v233_v24 = vsub.s32 32, %v232_v20  ;;  %v235_v26 = vshll.u32 %v954_v25, %v232_v20  ;;  %v238_v28 = vshll.u32 %v955_v27, %v232_v20  ;;  %v241_v30 = vshll.u32 %v956_v29, %v232_v20 }
  0x45   : > { %v244_v32 = vshll.u32 %v957_v31, %v232_v20  ;;  %v247_v34 = vshll.u32 %v958_v33, %v232_v20  ;;  %vm250_vm2 = vcmp.lt.s32.totalorder %v1115_v22, 1  ;;  %vm253_vm3 = vcmp.lt.s32.totalorder %v1115_v22, 4  ;;  %s579_s8 = smul.f32 0.01, %s1279_s25 }
  0x46   : > { %v236_v37 = vshrl.u32 %v955_v27, %v233_v24  ;;  %v239_v38 = vshrl.u32 %v956_v29, %v233_v24  ;;  %v242_v39 = vshrl.u32 %v957_v31, %v233_v24  ;;  %v245_v41 = vshrl.u32 %v958_v33, %v233_v24 }
  0x47   : > { %v248_v43 = vshrl.u32 %v959_v42, %v233_v24  ;;  %v1132_v47 = vsub.s32 32, %v1117_v23  ;;  %v234_v48 = vshrl.u32 %v954_v25, %v233_v24  ;;  %vm252_vm4 = vcmp.lt.s32.totalorder %v1115_v22, 3 }
  0x48   : > { %v237_v44 = vor.u32 %v236_v37, %v235_v26  ;;  %v240_v45 = vor.u32 %v239_v38, %v238_v28  ;;  %v243_v46 = vor.u32 %v242_v39, %v241_v30  ;;  %v246_v49 = vor.u32 %v245_v41, %v244_v32 }
  0x49   : > { %v249_v50 = vor.u32 %v248_v43, %v247_v34  ;;  %vm251_vm5 = vcmp.lt.s32.totalorder %v1115_v22, 2  ;;  %v391_v56 = vshll.u32 %v954_v25, %v1117_v23  ;;  %v394_v57 = vshll.u32 %v955_v27, %v1117_v23 }
  0x4a   : > { %v258_v51 = vsel %vm250_vm2, %v237_v44, %v240_v45  ;;  %v262_v52 = vsel %vm250_vm2, %v240_v45, %v243_v46  ;;  %v259_v54 = vsel %vm253_vm3, %v246_v49, 920167782  ;;  %v255_v58 = vsel %vm253_vm3, %v243_v46, 2102212464 }
  0x4b   : > { %v263_v55 = vsel %vm253_vm3, %v249_v50, 1326507024  ;;  %v260_v59 = vsel %vm252_vm4, %v243_v46, %v259_v54  ;;  %v392_v61 = vshrl.u32 %v955_v27, %v1132_v47  ;;  %v254_v62 = vsel %vm250_vm2, %v234_v48, %v237_v44 }
  0x4c   : > { %v264_v60 = vsel %vm252_vm4, %v246_v49, %v263_v55  ;;  %v261_v63 = vsel %vm251_vm5, %v258_v51, %v260_v59  ;;  %v395_v7 = vshrl.u32 %v956_v29, %v1132_v47  ;;  %v256_v12 = vsel %vm252_vm4, %v240_v45, %v255_v58 }
  0x4d   : > { %v265_v5 = vsel %vm251_vm5, %v262_v52, %v264_v60  ;;  %v291_v10 = vand.u32 65535, %v261_v63  ;;  %v292_v11 = vshrl.u32 %v261_v63, 16  ;;  %v1166_v13 = vor.u32 %v392_v61, %v391_v56 }
  0x4e   : > { %v269_v8 = vand.u32 65535, %v265_v5  ;;  %v270_v9 = vshrl.u32 %v265_v5, 16  ;;  %v1168_v14 = vor.u32 %v395_v7, %v394_v57  ;;  %v397_v15 = vshll.u32 %v956_v29, %v1117_v23 }
  0x4f   : > { %v398_v20 = vshrl.u32 %v957_v31, %v1132_v47  ;;  %v293_v24 = vmul.u32 %v291_v10, %v267_v35  ;;  %v294_v26 = vmul.u32 %v292_v11, %v267_v35  ;;  %v295_v27 = vmul.u32 %v291_v10, %v268_v40 }
  0x50   : > { %v271_v16 = vmul.u32 %v269_v8, %v267_v35  ;;  %v272_v17 = vmul.u32 %v270_v9, %v267_v35  ;;  %v273_v19 = vmul.u32 %v269_v8, %v268_v40  ;;  %v274_v21 = vmul.u32 %v270_v9, %v268_v40 }
  0x51   : > { %v296_v34 = vmul.u32 %v292_v11, %v268_v40  ;;  %v297_v38 = vshll.u32 %v294_v26, 16  ;;  %v298_v39 = vshrl.u32 %v294_v26, 16  ;;  %v299_v41 = vshll.u32 %v295_v27, 16 }
  0x52   : > { %v275_v28 = vshll.u32 %v272_v17, 16  ;;  %v276_v30 = vshrl.u32 %v272_v17, 16  ;;  %v277_v32 = vshll.u32 %v273_v19, 16  ;;  %v278_v37 = vshrl.u32 %v273_v19, 16 }
  0x53   : > { %v300_v43 = vshrl.u32 %v295_v27, 16  ;;  %v400_v44 = vshll.u32 %v957_v31, %v1117_v23  ;;  %v960_v45 = vmov 0   ;;  %vm301_vm7 = vc.u32 %v293_v24, %v297_v38 }
  0x54   : > { %vm279_vm6 = vc.u32 %v271_v16, %v275_v28  ;;  %v281_v29 = vadd.s32 %v275_v28, %v271_v16  ;;  %v303_v35 = vadd.s32 %v297_v38, %v293_v24  ;;  %v401_v48 = vshrl.u32 %v958_v33, %v1132_v47 }
  0x55   : > { %v280_v46 = vsel %vm279_vm6, 1, %v960_v45  ;;  %v302_v40 = vsel %vm301_vm7, 1, %v960_v45  ;;  %v403_v50 = vshll.u32 %v958_v33, %v1117_v23  ;;  %v399_v31 = vor.u32 %v398_v20, %v397_v15 }
  0x56   : > { %v282_v49 = vadd.s32 %v280_v46, %v274_v21  ;;  %vm283_vm8 = vc.u32 %v281_v29, %v277_v32  ;;  %v304_v52 = vadd.s32 %v302_v40, %v296_v34  ;;  %vm305_vm9 = vc.u32 %v303_v35, %v299_v41 }
  0x57   : > { %v284_v51 = vsel %vm283_vm8, 1, %v960_v45  ;;  %v306_v55 = vsel %vm305_vm9, 1, %v960_v45  ;;  %v402_v56 = vor.u32 %v401_v48, %v400_v44  ;;  %v404_v57 = vshrl.u32 %v959_v42, %v1132_v47 }
  0x58   : > { %v286_v54 = vadd.s32 %v284_v51, %v282_v49  ;;  %v1185_v58 = vadd.s32 %v303_v35, %v299_v41  ;;  %v308_v59 = vadd.s32 %v306_v55, %v304_v52  ;;  %vm406_vm10 = vcmp.lt.s32.totalorder %v1141_v53, 1 }
  0x59   : > { %vm408_vm11 = vcmp.lt.s32.totalorder %v1141_v53, 3  ;;  %v405_v33 = vor.u32 %v404_v57, %v403_v50  ;;  %vm407_vm12 = vcmp.lt.s32.totalorder %v1141_v53, 2  ;;  %vm409_vm13 = vcmp.lt.s32.totalorder %v1141_v53, 4 }
  0x5a   : > { %v287_v23 = vadd.s32 %v286_v54, %v276_v30  ;;  %v257_v60 = vsel %vm251_vm5, %v254_v62, %v256_v12  ;;  %v309_v61 = vadd.s32 %v308_v59, %v298_v39  ;;  %v414_v42 = vsel %vm406_vm10, %v1166_v13, %v1168_v14 }
  0x5b   : > { %v415_v63 = vsel %vm409_vm13, %v402_v56, 920167782  ;;  %v418_v8 = vsel %vm406_vm10, %v1168_v14, %v399_v31  ;;  %v423_v22 = vand.u32 65535, %v1123_v36  ;;  %v419_v10 = vsel %vm409_vm13, %v405_v33, 1326507024 }
  0x5c   : > { %v1199_v5 = vadd.s32 %v287_v23, %v278_v37  ;;  %v416_v7 = vsel %vm408_vm11, %v399_v31, %v415_v63  ;;  %v310_v62 = vadd.s32 %v309_v61, %v300_v43  ;;  %v424_v11 = vshrl.u32 %v1123_v36, 16 }
  0x5d   : > { %v417_v9 = vsel %vm407_vm12, %v414_v42, %v416_v7  ;;  %v311_v12 = vmul.u32 %v1113_v18, %v257_v60  ;;  %v420_v15 = vsel %vm408_vm11, %v402_v56, %v419_v10  ;;  %v390_v27 = vshrl.u32 %v954_v25, %v1132_v47 }
  0x5e   : > { %vm313_vm14 = vc.u32 %v1199_v5, %v1185_v58  ;;  %v447_v16 = vand.u32 65535, %v417_v9  ;;  %v314_v17 = vadd.s32 1, %v310_v62  ;;  %v421_v19 = vsel %vm407_vm12, %v418_v8, %v420_v15 }
  0x5f   : > { %v448_v20 = vshrl.u32 %v417_v9, 16  ;;  %v425_v21 = vand.u32 65535, %v421_v19  ;;  %v426_v24 = vshrl.u32 %v421_v19, 16  ;;  %v411_v29 = vsel %vm409_vm13, %v399_v31, 2102212464 }
  0x60   : > { %v315_v26 = vsel %vm313_vm14, %v314_v17, %v310_v62  ;;  %v451_v18 = vmul.u32 %v447_v16, %v424_v11  ;;  %v449_v37 = vmul.u32 %v447_v16, %v423_v22  ;;  %v410_v46 = vsel %vm406_vm10, %v390_v27, %v1166_v13 }
  0x61   : > { %v450_v28 = vmul.u32 %v448_v20, %v423_v22  ;;  %v316_v30 = vadd.s32 %v315_v26, %v311_v12  ;;  %v427_v32 = vmul.u32 %v425_v21, %v423_v22  ;;  %v428_v34 = vmul.u32 %v426_v24, %v423_v22 }
  0x62   : > { %v429_v38 = vmul.u32 %v425_v21, %v424_v11  ;;  %v430_v43 = vmul.u32 %v426_v24, %v424_v11  ;;  %v452_v25 = vmul.u32 %v448_v20, %v424_v11  ;;  %v455_v47 = vshll.u32 %v451_v18, 16 }
  0x63   : > { %v453_v39 = vshll.u32 %v450_v28, 16  ;;  %v317_v41 = vadd.s32 536870912, %v316_v30  ;;  %v431_v44 = vshll.u32 %v428_v34, 16  ;;  %v412_v40 = vsel %vm408_vm11, %v1168_v14, %v411_v29 }
  0x64   : > { %v433_v35 = vshll.u32 %v429_v38, 16  ;;  %v432_v13 = vshrl.u32 %v428_v34, 16  ;;  %v454_v56 = vshrl.u32 %v450_v28, 16  ;;  %v434_v23 = vshrl.u32 %v429_v38, 16 }
  0x65   : > { %v1226_v48 = vshrl.u32 %v317_v41, 30  ;;  %vm435_vm15 = vc.u32 %v427_v32, %v431_v44  ;;  %v437_v49 = vadd.s32 %v431_v44, %v427_v32  ;;  %vm457_vm0 = vc.u32 %v449_v37, %v453_v39 }
  0x66   : > { %v436_v50 = vsel %vm435_vm15, 1, %v960_v45  ;;  %v458_v51 = vsel %vm457_vm0, 1, %v960_v45  ;;  %v459_v52 = vadd.s32 %v453_v39, %v449_v37  ;;  %v456_v60 = vshrl.u32 %v451_v18, 16 }
  0x67   : > { %v319_v31 = vshll.u32 %v1226_v48, 30  ;;  %v438_v54 = vadd.s32 %v436_v50, %v430_v43  ;;  %vm439_vm1 = vc.u32 %v437_v49, %v433_v35  ;;  %v460_v57 = vadd.s32 %v458_v51, %v452_v25 }
  0x68   : > { %v440_v55 = vsel %vm439_vm1, 1, %v960_v45  ;;  %vm461_vm2 = vc.u32 %v459_v52, %v455_v47  ;;  %v463_v7 = vadd.s32 %v459_v52, %v455_v47  ;;  %v413_v8 = vsel %vm407_vm12, %v410_v46, %v412_v40 }
  0x69   : > { %v320_v59 = vsub.s32 %v316_v30, %v319_v31  ;;  %v442_v33 = vadd.s32 %v440_v55, %v438_v54  ;;  %v462_v14 = vsel %vm461_vm2, 1, %v960_v45  ;;  %v467_v12 = vmul.u32 %v1123_v36, %v413_v8 }
  0x6a   : > { %v464_v61 = vadd.s32 %v462_v14, %v460_v57  ;;  %v312_v45 = vadd.s32 %v1185_v58, %v1199_v5  ;;  %vm220_vm7 = vcmp.lt.s32.totalorder %v1100_v2, 0  ;;  %v529_v29 = vsub.f32 0.0, %v1095_v0 }
  0x6b   : > { %vm321_vm3 = vcmp.lt.s32.totalorder %v320_v59, 0  ;;  %v322_v42 = vsub.s32 0, %v320_v59  ;;  %v443_v63 = vadd.s32 %v442_v33, %v432_v13  ;;  %vm1250_vm8 = vcmp.le.f32.partialorder %v218_v4, 0.7853982 }
  0x6c   : > { %v465_v22 = vadd.s32 %v464_v61, %v454_v56  ;;  %v530_v35 = vmul.f32 %v529_v29, %v1095_v0  ;;  %v534_v4 = vadd.f32 %v1097_v1, %v1095_v0  ;;  %v1291_v8 = vstv %s538_s24 }
  0x6d   : > { %v323_v62 = vsel %vm321_vm3, %v322_v42, %v320_v59  ;;  %v444_v9 = vadd.s32 %v443_v63, %v434_v23  ;;  %v542_v42 = vstv %s1266_s20  ;;  %v342_v63 = vsub.s32 4, %v1226_v48  ;;  %s604_s20 = sshll.u32 %s601_s18, 4  ;;  %s605_s20 = int_to_ptr.hbm [resolvable:$true] %s604_s20 }
  0x6e   : > { %v324_v10 = vclz %v323_v62  ;;  %v466_v11 = vadd.s32 %v465_v22, %v456_v60  ;;  %v531_v40 = vmul.f32 1.442695, %v530_v35  ;;  %812 = vtanh.f32 %v534_v4  ;;  %s890_s21 = sshra.s32 %s605_s20, 4  ;;  %s891_s21 = int_to_ptr.hbm [resolvable:$true] %s890_s21 }
  0x6f   : > { %vm469_vm4 = vc.u32 %v444_v9, %v463_v7  ;;  %v468_v51 = vadd.s32 %v463_v7, %v444_v9  ;;  %vm376_vm10 = vcmp.lt.s32.totalorder %v1103_v3, 0  ;;  %vm1317_vm11 = vcmp.le.f32.partialorder %v374_v6, 0.7853982  ;;  %p897_p7 = scmp.lt.s32.totalorder %s891_s21, %s1393_s3 }
  0x70   : > { %v712_v15 = vadd.s32 4294967294, %v324_v10  ;;  %v470_v16 = vadd.s32 1, %v466_v11  ;;  %814 = vpow2.f32 %v531_v40  ;;  %v533_v10 = vmul.f32 0.1, %v1097_v1 }
  0x71   : > { %vm361_vm0 = vweird.f32 %v1100_v2  ;;  %vm517_vm3 = vweird.f32 %v1103_v3 }
  0x72   : > { %vm713_vm5 = vcmp.lt.s32.totalorder %v712_v15, 0  ;;  %v471_v17 = vsel %vm469_vm4, %v470_v16, %v466_v11  ;;  %v1295_v16 = vstv %s553_s29 }
  0x73   : > { %v327_v19 = vsel %vm713_vm5, 0, %v712_v15  ;;  %v472_v20 = vadd.s32 %v471_v17, %v467_v12 }
  0x74   : > { %v328_v21 = vsub.s32 32, %v327_v19  ;;  %v329_v53 = vshll.u32 %v320_v59, %v327_v19  ;;  %v332_v24 = vsub.s32 4294967266, %v327_v19  ;;  %v813_v60 = vpop.eup %812 }
  0x75   : > { %v473_v26 = vadd.s32 536870912, %v472_v20  ;;  %v547_v11 = vmul.f32 %v813_v60, %v542_v42 }
  0x76   : > { %v330_v27 = vshrl.u32 %v312_v45, %v328_v21  ;;  %v333_v28 = vadd.s32 127, %v332_v24  ;;  %v815_v22 = vpop.eup %814  ;;  %v557_v45 = vstv %s1274_s22  ;;  %v1300_v24 = vstv %s566_s4  ;;  %s892_s22 = scalar_lea.hbm %s891_s21, 12 }
  0x77   : > { %v1241_v18 = vshrl.u32 %v473_v26, 30  ;;  %v543_v15 = vmul.f32 %v815_v22, %v542_v42  ;;  %v548_v19 = vsub.f32 %v547_v11, %v1291_v8  ;;  %v561_v21 = vmul.f32 %v813_v60, %v557_v45  ;;  %p893_p1 = scmp.ne.s32.totalorder %s891_s21, %s892_s22  ;;  %p898_p2 = scmp.lt.s32.totalorder %s896_s26, %s892_s22 }
  0x78   : > { %v331_v30 = vor.u32 %v330_v27, %v329_v53  ;;  %v334_v36 = vshll.u32 %v333_v28, 23  ;;  %v570_v28 = vstv %s1282_s28 }
  0x79   : > { %v475_v32 = vshll.u32 %v1241_v18, 30  ;;  %v544_v53 = vadd.f32 %v543_v15, %v533_v10  ;;  %718 = vst [vmem:[%s1305_s9 + $0x8] sm:$0x1] %v548_v19  ;;  %v562_v27 = vsub.f32 %v561_v21, %v1295_v16  ;;  %p894_p4 = pnand %p893_p1, %p1052_p3  ;;  %p899_p9 = por %p898_p2, %p897_p7 }
  0x7a   : > { %v335_v34 = vor.u32 4788187, %v334_v36  ;;  %v338_v37 = vcvt.s32.f32 %v331_v30  ;;  %v343_v30 = vsel %vm220_vm7, %v342_v63, %v1226_v48 }
  0x7b   : > { %v476_v38 = vsub.s32 %v472_v20, %v475_v32  ;;  %v558_v20 = vmul.f32 %v815_v22, %v557_v45  ;;  %717 = vst [vmem:[%s1305_s9 + $0x4] sm:$0x1] %v544_v53  ;;  %v571_v32 = vmul.f32 %v815_v22, %v570_v28  ;;  %v345_v29 = vsel %vm1250_vm8, 0, %v343_v30  ;;  %p895_p8 = pneg %p894_p4 }
  0x7c   : > { %v336_v58 = vand.u32 2147483647, %v335_v34  ;;  %v574_v34 = vmul.f32 %v813_v60, %v570_v28  ;;  %722 = vst [vmem:[%s1305_s9 + $0x9] sm:$0x1] %v562_v27 }
  0x7d   : > { %vm477_vm6 = vcmp.lt.s32.totalorder %v476_v38, 0  ;;  %v478_v5 = vsub.s32 0, %v476_v38  ;;  %v559_v26 = vadd.f32 %v558_v20, %v533_v10  ;;  %p900_p10 = pnand %p899_p9, %p895_p8 }
  0x7e   : > { %v339_v39 = vmul.f32 %v338_v37, %v336_v58  ;;  %v575_v48 = vsub.f32 %v574_v34, %v1300_v24 }
  0x7f   : > { %v479_v41 = vsel %vm477_vm6, %v478_v5, %v476_v38  ;;  %721 = vst [vmem:[%s1305_s9 + $0x5] sm:$0x1] %v559_v26  ;;  %v583_v5 = vstv %s1287_s30 }
  0x80   : > { %v340_v44 = vxor.u32 2147483648, %v339_v39  ;;  %v480_v46 = vclz %v479_v41  ;;  %v1325_v41 = vstv %s579_s8  ;;  %726 = vst [vmem:[%s1305_s9 + $0xa] sm:$0x1] %v575_v48 }
  0x82   : > { %v341_v25 = vsel %vm220_vm7, %v340_v44, %v339_v39  ;;  %v715_v47 = vadd.s32 4294967294, %v480_v46  ;;  %v572_v39 = vadd.f32 %v571_v32, %v533_v10  ;;  %v584_v44 = vmul.f32 %v815_v22, %v583_v5 }
  0x83   : > { %v1262_v49 = vsel %vm1250_vm8, %v1100_v2, %v341_v25  ;;  %v587_v46 = vmul.f32 %v813_v60, %v583_v5  ;;  %v498_v25 = vsub.s32 4, %v1241_v18 }
  0x84   : > { %v1270_v50 = vmul.f32 %v1262_v49, %v1262_v49  ;;  %vm716_vm9 = vcmp.lt.s32.totalorder %v715_v47, 0  ;;  %725 = vst [vmem:[%s1305_s9 + $0x6] sm:$0x1] %v572_v39  ;;  %v585_v43 = vadd.f32 %v584_v44, %v533_v10 }
  0x85   : > { %v483_v52 = vsel %vm716_vm9, 0, %v715_v47 }
  0x86   : > { %v347_v31 = vmul.f32 -0.001358992, %v1270_v50  ;;  %v354_v0 = vmul.f32 -0.00019511016, %v1270_v50  ;;  %v484_v13 = vsub.s32 32, %v483_v52  ;;  %v485_v54 = vshll.u32 %v476_v38, %v483_v52 }
  0x87   : > { %v488_v55 = vsub.s32 4294967266, %v483_v52  ;;  %v362_v52 = vadd.s32 3, %v345_v29  ;;  %729 = vst [vmem:[%s1305_s9 + $0x7] sm:$0x1] %v585_v43 }
  0x88   : > { %v348_v56 = vadd.f32 0.041655596, %v347_v31  ;;  %v355_v57 = vadd.f32 0.008332121, %v354_v0  ;;  %v486_v59 = vshrl.u32 %v468_v51, %v484_v13  ;;  %v588_v51 = vsub.f32 %v587_v46, %v1325_v41 }
  0x89   : > { %v489_v23 = vadd.s32 127, %v488_v55 }
  0x8a   : > { %v356_v33 = vmul.f32 %v355_v57, %v1270_v50  ;;  %v487_v14 = vor.u32 %v486_v59, %v485_v54  ;;  %v349_v7 = vmul.f32 %v348_v56, %v1270_v50  ;;  %730 = vst [vmem:[%s1305_s9 + $0xb] sm:$0x1] %v588_v51  ;;  %v363_v57 = vand.u32 3, %v362_v52 }
  0x8b   : > { %v490_v61 = vshll.u32 %v489_v23, 23 }
  0x8c   : > { %v494_v9 = vcvt.s32.f32 %v487_v14  ;;  %v357_v12 = vadd.f32 -0.16666654, %v356_v33  ;;  %v350_v36 = vadd.f32 -0.4999988, %v349_v7  ;;  %vm365_vm12 = vcmp.eq.s32.totalorder %v363_v57, 0 }
  0x8d   : > { %v491_v62 = vor.u32 4788187, %v490_v61  ;;  %vm368_vm13 = vcmp.eq.s32.totalorder %v363_v57, 2  ;;  %vm364_vm14 = vcmp.lt.s32.totalorder %v363_v57, 2 }
  0x8e   : > { %v358_v37 = vmul.f32 %v357_v12, %v1270_v50  ;;  %v351_v35 = vmul.f32 %v350_v36, %v1270_v50  ;;  %v499_v50 = vsel %vm376_vm10, %v498_v25, %v1241_v18 }
  0x8f   : > { %v492_v17 = vand.u32 2147483647, %v491_v62  ;;  %v501_v59 = vsel %vm1317_vm11, 0, %v499_v50 }
  0x90   : > { %v359_v4 = vadd.f32 1.0, %v358_v37  ;;  %v352_v13 = vadd.f32 1.0, %v351_v35  ;;  %v518_v63 = vand.u32 3, %v501_v59 }
  0x91   : > { %v495_v1 = vmul.f32 %v494_v9, %v492_v17 }
  0x92   : > { %v360_v54 = vmul.f32 %v359_v4, %v1262_v49  ;;  %v369_v60 = vxor.u32 2147483648, %v352_v13  ;;  %vm523_vm15 = vcmp.eq.s32.totalorder %v518_v63, 2  ;;  %vm520_vm1 = vcmp.eq.s32.totalorder %v518_v63, 0 }
  0x93   : > { %v496_v58 = vxor.u32 2147483648, %v495_v1  ;;  %vm519_vm2 = vcmp.lt.s32.totalorder %v518_v63, 2 }
  0x94   : > { %v366_v14 = vxor.u32 2147483648, %v360_v54  ;;  %v370_v22 = vsel %vm368_vm13, %v369_v60, %v360_v54 }
  0x95   : > { %v497_v6 = vsel %vm376_vm10, %v496_v58, %v495_v1 }
  0x96   : > { %v500_v47 = vsel %vm1317_vm11, %v1103_v3, %v497_v6  ;;  %v367_v49 = vsel %vm365_vm12, %v352_v13, %v366_v14 }
  0x97   : > { %v502_v40 = vmul.f32 %v500_v47, %v500_v47  ;;  %v371_v12 = vsel %vm364_vm14, %v367_v49, %v370_v22 }
  0x98   : > { %v372_v17 = vsel %vm361_vm0, nan, %v371_v12 }
  0x99   : > { %v503_v31 = vmul.f32 -0.001358992, %v502_v40  ;;  %v510_v0 = vmul.f32 -0.00019511016, %v502_v40 }
  0x9b   : > { %v504_v55 = vadd.f32 0.041655596, %v503_v31  ;;  %v511_v56 = vadd.f32 0.008332121, %v510_v0 }
  0x9d   : > { %v505_v23 = vmul.f32 %v504_v55, %v502_v40  ;;  %v512_v33 = vmul.f32 %v511_v56, %v502_v40 }
  0x9f   : > { %v506_v61 = vadd.f32 -0.4999988, %v505_v23  ;;  %v513_v42 = vadd.f32 -0.16666654, %v512_v33 }
  0xa1   : > { %v507_v18 = vmul.f32 %v506_v61, %v502_v40  ;;  %v514_v7 = vmul.f32 %v513_v42, %v502_v40 }
  0xa3   : > { %v508_v62 = vadd.f32 1.0, %v507_v18  ;;  %v515_v9 = vadd.f32 1.0, %v514_v7 }
  0xa5   : > { %v516_v10 = vmul.f32 %v515_v9, %v500_v47  ;;  %v524_v11 = vxor.u32 2147483648, %v508_v62 }
  0xa7   : > { %v521_v15 = vxor.u32 2147483648, %v516_v10  ;;  %v525_v45 = vsel %vm523_vm15, %v524_v11, %v516_v10 }
  0xa9   : > { %v522_v19 = vsel %vm520_vm1, %v508_v62, %v521_v15 }
  0xaa   : > { %v526_v20 = vsel %vm519_vm2, %v522_v19, %v525_v45 }
  0xab   : > { %v527_v2 = vsel %vm517_vm3, nan, %v526_v20 }
  0xac   : > { %v528_v21 = vmul.f32 %v527_v2, %v372_v17 }
  0xae   : > { %v540_v53 = vadd.f32 %v1291_v8, %v528_v21  ;;  %v555_v3 = vadd.f32 %v1295_v16, %v528_v21  ;;  %v568_v1 = vadd.f32 %v1300_v24, %v528_v21  ;;  %v581_v26 = vadd.f32 %v1325_v41, %v528_v21 }
  0xb0   : > { %541 = vst [vmem:[%s1305_s9] sm:$0x1] %v540_v53 }
  0xb1   : > { %556 = vst [vmem:[%s1305_s9 + $0x1] sm:$0x1] %v555_v3 }
  0xb2   : > { %569 = vst [vmem:[%s1305_s9 + $0x2] sm:$0x1] %v568_v1 }
  0xb3   : > { %582 = vst [vmem:[%s1305_s9 + $0x3] sm:$0x1] %v581_v26 }
  0xb4   : > { %903 = shalt.err (!%p900_p10)
}
  0xb5   : > { %s961_s7 = smov 64   ;;  %s962_s30 = smov 192  }
  0xb6   : > { %s963_s4 = smov 4  }
  0xb7   : > { %745 = dma.vmem_to_hbm [thread:$0]  (%p1052_p3), %s603_s17, 192, %s605_s20, %s591_s16, %s961_s7, %s962_s30, %s963_s4  }
  0xb8 PF: > { %p767_p11 = scmp.ge.s32.totalorder %s950_s15, 2  ;;  %s619_s8 = sand.u32 1, %s938_s12  }
  0xb9   : > { %s620_s9 = scalar_lea.sflag [#allocation4], %s619_s8 }
  0xba   : > { %p759_p12 = pnand %p767_p11, %p1019_p6 }
  0xbc   : > { %p760_p13 = pneg %p759_p12 }
  0xbe   : > { %933 = dma.done.wait (%p760_p13), %s620_s9, 192  }
  0xbf   : > { %935 = vsyncadd (%p760_p13), %s620_s9, 4294967104  ;;  %p18_p0 = scmp.ge.s32.totalorder %s1039_s27, 5   ;;  %s1403_s12 = smov %s942_s13 }
  0xc0   : > { %s1404_s13 = smov %s946_s14  ;;  %s1405_s14 = smov %s1048_s5 }
  0xc1   : > { %s1406_s15 = smov %s1039_s27  ;;  %20 = sbr.rel (!%p18_p0) target bundleno = 7 (0x7), region = 88 }
  0xc6   :  { %626 = vsyncpa [#allocation3], 1 }
  0xc7   :  { %628 = vsyncpa [#allocation3 + $0x1], 1 }
  0xc8   :  { %629 = vsyncpa [#allocation4], 1 }
  0xc9   :  { %631 = vsyncpa [#allocation4 + $0x1], 1 }
  0xca   :  { %632 = vsyncpa [#allocation5], 1 }
  0xcb   :  { %634 = vsyncpa [#allocation5 + $0x1], 1 }
  0xcc   :  { %635 = vsyncpa [#allocation7], 1 }

</bundles_post_ra>
